<compile_context>
chip_gen: v7x
topology: tpu7x:2x2x1
jax: 0.10.0
libtpu: 0.0.40
codegen_flags: <defaults>
</compile_context>

<pallas_src>
import functools

import jax
import jax.numpy as jnp
from jax.experimental import pallas as pl
from jax.experimental.pallas import tpu as pltpu

_LANE = 128          # TPU lane width
_INNER = 8192        # inner compute sub-chunk (lanes); bounds the (16, C) intermediate


def _cdiv(a, b):
    return -(-a // b)


def _round_up(a, m):
    return _cdiv(a, m) * m


def coordnet_kernel(x_ref, w1_ref, b1_ref, w3_ref, b3_ref, o_ref, *,
                    inner, n_chunks):
    """Fused CoordNet forward on one feature-major lane tile.

    x_ref : (2, T)  coordinates (rows = input features, lanes = samples)
    w1_ref: (16, 2) fused (w1 @ w2)^T          b1_ref: (16, 1) fused bias
    w3_ref: (3, 16) w3^T                       b3_ref: (3, 1)  bias
    o_ref : (3, T)  outputs (rows = output features, lanes = samples)

    The big DMA tile T is processed in `n_chunks` sub-chunks of `inner` lanes
    so the (16, inner) hidden activation stays a few hundred KB of VMEM while
    the pipelined DMA tile stays large enough to amortize per-step overhead.
    """
    # Hoist the tiny parameter reads out of the inner loop.
    w1 = w1_ref[...]          # (16, 2)
    b1 = b1_ref[...]          # (16, 1)
    w3 = w3_ref[...]          # (3, 16)
    b3 = b3_ref[...]          # (3, 1)

    def body(c, carry):
        start = pl.multiple_of(c * inner, inner)
        xc = x_ref[:, pl.ds(start, inner)]                              # (2, inner)

        # Fused Linear(2,16)+Linear(16,16) on the MXU (keeps the VPU free for
        # bias + LeakyReLU; matters on v7x/v6e where HBM stops being the limit).
        h = jnp.dot(w1, xc, preferred_element_type=jnp.float32) + b1    # (16, inner)

        # LeakyReLU (PyTorch default negative_slope = 0.01); exact as a max
        # for slopes in (0, 1).
        h = jnp.maximum(h, 0.01 * h)

        # Final Linear(16,3): small (3,16)@(16,inner) MXU dot; hides under
        # the HBM DMA stream.
        y = jnp.dot(w3, h, preferred_element_type=jnp.float32) + b3     # (3, inner)

        o_ref[:, pl.ds(start, inner)] = y.astype(o_ref.dtype)
        return carry

    jax.lax.fori_loop(0, n_chunks, body, 0, unroll=(n_chunks <= 8))


def _vmem_limit_bytes():
    """Physical-VMEM-aware scoped limit (v5e/v6e: 128 MiB, v7x: 64 MiB)."""
    cap = 0
    try:
        cap = int(getattr(pltpu.get_tpu_info(), "vmem_capacity_bytes", 0) or 0)
    except Exception:
        cap = 0
    if cap <= 0:
        cap = 64 * 1024 * 1024            # conservative fallback (v7x-sized VMEM)
    # Leave generous headroom: ~60% of physical, never above 96 MB.
    return int(min((cap * 3) // 5, 96 * 1024 * 1024))


def _select_tile(n, vmem_limit):
    """Pick (DMA tile, inner chunk) in lanes.

    Pipeline VMEM per lane of tile: the (2,T) input and (3,T) output f32
    blocks each pad to 8 sublanes (32*T bytes) and are double-buffered
    -> ~128 B/lane, plus a fixed budget for the (16, inner) intermediates.
    """
    per_lane = 128
    fixed = 6 * 1024 * 1024
    cap = max(_LANE, (vmem_limit - fixed) // per_lane)
    # v7x (64 MiB VMEM -> ~40 MB limit): cap at 128K lanes; v5e/v6e: 256K.
    hard_cap = 256 * 1024 if vmem_limit >= 64 * 1024 * 1024 else 128 * 1024
    cap = min(cap, hard_cap)
    # Keep the grid >= 4 steps when N allows (>= 2 per TensorCore on v7x) so
    # each core still double-buffers its own DMA.
    want = _round_up(max(_cdiv(n, 4), 1), _LANE)
    tile = max(_LANE, min(cap, want))
    if tile >= _INNER:
        tile = (tile // _INNER) * _INNER
        inner = _INNER
    else:
        inner = tile
    return int(tile), int(inner)


def _normalize_tile(tile):
    tile = max(_LANE, _round_up(int(tile), _LANE))
    if tile >= _INNER:
        tile = _round_up(tile, _INNER)
        inner = _INNER
    else:
        inner = tile
    return tile, inner


@functools.partial(
    jax.jit,
    static_argnames=("tile", "inner", "vmem_limit", "out_dtype", "feature_major"),
)
def _coordnet_impl(x, w1, b1, w2, b2, w3, b3, *, tile, inner, vmem_limit,
                   out_dtype, feature_major):
    # Algebraic fusion of Linear(2,16)+Linear(16,16) (no activation between
    # them): exact up to f32 rounding vs the unfused PyTorch reference.
    w12t = (w1 @ w2).T                       # (16, 2)
    b12t = (b1 @ w2 + b2).T                  # (16, 1)
    w3t = w3.T                               # (3, 16)
    b3t = b3.T                               # (3, 1)

    xt = x if feature_major else x.T         # (2, N) lane-dense layout
    n = xt.shape[1]
    grid = (_cdiv(n, tile),)                 # ragged tail handled by OOB masking

    kernel = functools.partial(coordnet_kernel, inner=inner,
                               n_chunks=tile // inner)

    out_fm = pl.pallas_call(
        kernel,
        out_shape=jax.ShapeDtypeStruct((3, n), out_dtype),
        grid_spec=pltpu.PrefetchScalarGridSpec(
            num_scalar_prefetch=0,
            grid=grid,
            in_specs=[
                pl.BlockSpec((2, tile), lambda i: (0, i)),   # x, lane-tiled
                pl.BlockSpec((16, 2), lambda i: (0, 0)),     # fused W12^T (resident)
                pl.BlockSpec((16, 1), lambda i: (0, 0)),     # fused bias
                pl.BlockSpec((3, 16), lambda i: (0, 0)),     # W3^T
                pl.BlockSpec((3, 1), lambda i: (0, 0)),      # b3
            ],
            out_specs=pl.BlockSpec((3, tile), lambda i: (0, i)),
        ),
        compiler_params=pltpu.CompilerParams(
            dimension_semantics=("parallel",),
            vmem_limit_bytes=vmem_limit,
        ),
    )(xt, w12t, b12t, w3t, b3t)

    return out_fm if feature_major else out_fm.T


def coordnet_forward_feature_major(x_fm, params, *, tile=None,
                                   out_dtype=jnp.float32):
    """Primary (copy-free) path: x_fm (2, N) float32 -> (3, N).

    No wrapper-side pads or transposes; the batch dim stays on the 128-lane
    axis end to end.
    """
    n = int(x_fm.shape[1])
    vmem_limit = _vmem_limit_bytes()
    if tile is None:
        tile, inner = _select_tile(n, vmem_limit)
    else:
        tile, inner = _normalize_tile(tile)
    return _coordnet_impl(x_fm, params["w1"], params["b1"], params["w2"],
                          params["b2"], params["w3"], params["b3"],
                          tile=tile, inner=inner, vmem_limit=vmem_limit,
                          out_dtype=out_dtype, feature_major=True)


def coordnet_forward(x, params, *, tile=None, out_dtype=jnp.float32):
    """PyTorch-contract path: x (N, 2) float32 -> (N, 3).

    This compatibility wrapper pays one (N,2)->(2,N) transpose on input and
    one (3,N)->(N,3) on output inside the same XLA program.  Prefer the
    feature-major API when the caller can supply/consume that layout.
    """
    n = int(x.shape[0])
    vmem_limit = _vmem_limit_bytes()
    if tile is None:
        tile, inner = _select_tile(n, vmem_limit)
    else:
        tile, inner = _normalize_tile(tile)
    return _coordnet_impl(x, params["w1"], params["b1"], params["w2"],
                          params["b2"], params["w3"], params["b3"],
                          tile=tile, inner=inner, vmem_limit=vmem_limit,
                          out_dtype=out_dtype, feature_major=False)


def init_params(key):
    """Deterministic synthetic params matching nn.Linear shapes.

    PyTorch Linear(in,out) has weight (out,in), bias (out,).  We store the
    transpose (in,out) and keep bias as (1,out) so y = x @ W + b.
    """
    ks = jax.random.split(key, 6)

    def linear(kw, kb, fan_in, fan_out):
        bound = 1.0 / jnp.sqrt(fan_in)
        w = jax.random.uniform(kw, (fan_in, fan_out), jnp.float32,
                               -bound, bound)
        b = jax.random.uniform(kb, (1, fan_out), jnp.float32, -bound, bound)
        return w, b

    w1, b1 = linear(ks[0], ks[1], 2, 16)
    w2, b2 = linear(ks[2], ks[3], 16, 16)
    w3, b3 = linear(ks[4], ks[5], 16, 3)
    return {"w1": w1, "b1": b1, "w2": w2, "b2": b2, "w3": w3, "b3": b3}


def coordnet_reference(x, p):
    """Unfused reference, exactly mirroring the PyTorch module."""
    h1 = x @ p["w1"] + p["b1"]
    h2 = h1 @ p["w2"] + p["b2"]
    h2 = jnp.where(h2 >= 0, h2, 0.01 * h2)
    return h2 @ p["w3"] + p["b3"]


if __name__ == "__main__":
    key = jax.random.PRNGKey(0)
    kx, kp = jax.random.split(key)

    # Small N, deliberately not a multiple of 128 or of the tile: exercises
    # the ragged-tail (masked) last grid block and the >=4-step grid heuristic.
    N = 3000
    x = jax.random.normal(kx, (N, 2), jnp.float32)
    params = init_params(kp)

    # Primary copy-free feature-major path (2,N) -> (3,N).
    x_fm = jnp.asarray(x.T)
    out_fm = jax.block_until_ready(coordnet_forward_feature_major(x_fm, params))

    # PyTorch-contract compatibility path (N,2) -> (N,3).
    out = jax.block_until_ready(coordnet_forward(x, params))

    ref = coordnet_reference(x, params)
    assert out_fm.shape == (3, N)
    assert out.shape == (N, 3)
    # Tolerance-based: layer-1/2 fusion and MXU f32 dots differ from the
    # unfused reference only by rounding.
    assert jnp.allclose(out_fm.T, ref, atol=1e-4, rtol=1e-4), "feature-major mismatch"
    assert jnp.allclose(out, ref, atol=1e-4, rtol=1e-4), "compat-path mismatch"

    print("KERNEL_OK")
</pallas_src>

<mosaic_0001>
module attributes {stable_mosaic.version = 11 : i64} {
  func.func @coordnet_kernel(%arg0: i32, %arg1: memref<2x768xf32, #tpu.memory_space<vmem>>, %arg2: memref<16x2xf32, #tpu.memory_space<vmem>>, %arg3: memref<16x1xf32, #tpu.memory_space<vmem>>, %arg4: memref<3x16xf32, #tpu.memory_space<vmem>>, %arg5: memref<3x1xf32, #tpu.memory_space<vmem>>, %arg6: memref<3x768xf32, #tpu.memory_space<vmem>>) attributes {dimension_semantics = [#tpu.dimension_semantics<parallel>], iteration_bounds = array<i64: 4>, scalar_prefetch = 0 : i64, scratch_operands = 0 : i64, tpu.core_type = #tpu.core_type<tc>, window_params = [{transform_indices = @transform_0, window_bounds = array<i64: 2, 768>}, {pipeline_mode = #tpu.pipeline_mode<synchronous>, transform_indices = @transform_1, window_bounds = array<i64: 16, 2>}, {pipeline_mode = #tpu.pipeline_mode<synchronous>, transform_indices = @transform_2, window_bounds = array<i64: 16, 1>}, {pipeline_mode = #tpu.pipeline_mode<synchronous>, transform_indices = @transform_3, window_bounds = array<i64: 3, 16>}, {pipeline_mode = #tpu.pipeline_mode<synchronous>, transform_indices = @transform_4, window_bounds = array<i64: 3, 1>}, {transform_indices = @transform_5, window_bounds = array<i64: 3, 768>}]} {
    %c0 = arith.constant 0 : index
    %c0_0 = arith.constant 0 : index
    %0 = vector.load %arg2[%c0, %c0_0] : memref<16x2xf32, #tpu.memory_space<vmem>>, vector<16x2xf32>
    %c0_1 = arith.constant 0 : index
    %c0_2 = arith.constant 0 : index
    %1 = vector.load %arg3[%c0_1, %c0_2] : memref<16x1xf32, #tpu.memory_space<vmem>>, vector<16x1xf32>
    %c0_3 = arith.constant 0 : index
    %c0_4 = arith.constant 0 : index
    %2 = vector.load %arg4[%c0_3, %c0_4] : memref<3x16xf32, #tpu.memory_space<vmem>>, vector<3x16xf32>
    %c0_5 = arith.constant 0 : index
    %c0_6 = arith.constant 0 : index
    %3 = vector.load %arg5[%c0_5, %c0_6] : memref<3x1xf32, #tpu.memory_space<vmem>>, vector<3x1xf32>
    %c0_i32 = arith.constant 0 : i32
    %c768_i32 = arith.constant 768 : i32
    %4 = arith.muli %c0_i32, %c768_i32 : i32
    %5 = tpu.assume_multiple %4, 768 : i32
    %c0_7 = arith.constant 0 : index
    %6 = arith.index_cast %5 : i32 to index
    %7 = vector.load %arg1[%c0_7, %6] : memref<2x768xf32, #tpu.memory_space<vmem>>, vector<2x768xf32>
    %cst = arith.constant dense<0.000000e+00> : vector<16x768xf32>
    %8 = tpu.matmul %0, %7, %cst {dimension_numbers = #tpu.dot_dimension_numbers<[1], [0], [0], [1], [0, 0, 1, 1], [], []>} : vector<16x2xf32>, vector<2x768xf32>, vector<16x768xf32> -> vector<16x768xf32>
    %9 = vector.broadcast %1 : vector<16x1xf32> to vector<16x768xf32>
    %10 = arith.addf %8, %9 : vector<16x768xf32>
    %cst_8 = arith.constant 0.00999999977 : f32
    %11 = vector.broadcast %cst_8 : f32 to vector<16x768xf32>
    %12 = arith.mulf %11, %10 : vector<16x768xf32>
    %13 = arith.maximumf %10, %12 : vector<16x768xf32>
    %cst_9 = arith.constant dense<0.000000e+00> : vector<3x768xf32>
    %14 = tpu.matmul %2, %13, %cst_9 {dimension_numbers = #tpu.dot_dimension_numbers<[1], [0], [0], [1], [0, 0, 1, 1], [], []>} : vector<3x16xf32>, vector<16x768xf32>, vector<3x768xf32> -> vector<3x768xf32>
    %15 = vector.broadcast %3 : vector<3x1xf32> to vector<3x768xf32>
    %16 = arith.addf %14, %15 : vector<3x768xf32>
    %c0_10 = arith.constant 0 : index
    %17 = arith.index_cast %5 : i32 to index
    %18 = vector.load %arg6[%c0_10, %17] : memref<3x768xf32, #tpu.memory_space<vmem>>, vector<3x768xf32>
    tpu.vector_store %arg6[%c0_10, %17], %16 {strides = array<i32>} : memref<3x768xf32, #tpu.memory_space<vmem>>, vector<3x768xf32>,
    %c1_i32 = arith.constant 1 : i32
    return
  }
  func.func @transform_0(%arg0: i32) -> (i32, i32) {
    %c0_i32 = arith.constant 0 : i32
    %c0_i32_0 = arith.constant 0 : i32
    return %c0_i32, %arg0 : i32, i32
  }
  func.func @transform_1(%arg0: i32) -> (i32, i32) {
    %c0_i32 = arith.constant 0 : i32
    %c0_i32_0 = arith.constant 0 : i32
    %c0_i32_1 = arith.constant 0 : i32
    return %c0_i32, %c0_i32_0 : i32, i32
  }
  func.func @transform_2(%arg0: i32) -> (i32, i32) {
    %c0_i32 = arith.constant 0 : i32
    %c0_i32_0 = arith.constant 0 : i32
    %c0_i32_1 = arith.constant 0 : i32
    return %c0_i32, %c0_i32_0 : i32, i32
  }
  func.func @transform_3(%arg0: i32) -> (i32, i32) {
    %c0_i32 = arith.constant 0 : i32
    %c0_i32_0 = arith.constant 0 : i32
    %c0_i32_1 = arith.constant 0 : i32
    return %c0_i32, %c0_i32_0 : i32, i32
  }
  func.func @transform_4(%arg0: i32) -> (i32, i32) {
    %c0_i32 = arith.constant 0 : i32
    %c0_i32_0 = arith.constant 0 : i32
    %c0_i32_1 = arith.constant 0 : i32
    return %c0_i32, %c0_i32_0 : i32, i32
  }
  func.func @transform_5(%arg0: i32) -> (i32, i32) {
    %c0_i32 = arith.constant 0 : i32
    %c0_i32_0 = arith.constant 0 : i32
    return %c0_i32, %arg0 : i32, i32
  }
}

</mosaic_0001>

<bundles_post_ra>
// kernel: _coordnet_impl.1
= control target key start
LH: loop header
LB: loop body
LE: loop exit
PB: predicated region body
PF: predicated region fallthrough
CT: control target
= control target key end

     0   :  { %10 = vsyncpa [#allocation3], 0  ;;  %s1176_s0 = inlined_call_operand.vmem [shape: f32[2,3000], index: 0, kind: input, shape index: {}]   ;;  %s1177_s1 = inlined_call_operand.vmem [shape: f32[16,2], index: 1, kind: input, shape index: {}]   ;;  %s1178_s2 = inlined_call_operand.vmem [shape: f32[16,1], index: 2, kind: input, shape index: {}]   ;;  %s1179_s3 = inlined_call_operand.vmem [shape: f32[3,16], index: 3, kind: input, shape index: {}]   ;;  %s1180_s4 = inlined_call_operand.vmem [shape: f32[3,1], index: 4, kind: input, shape index: {}]   ;;  %s1181_s5 = inlined_call_operand.hbm [shape: f32[3,3000], index: 5, kind: output, shape index: {}]  }
   0x1   :  { %12 = vsyncpa [#allocation3 + $0x1], 0  ;;  %s1038_s18 = smov 0   ;;  %s1040_s19 = smov 0  }
   0x2   :  { %s1042_s20 = smov 0   ;;  %s1044_s21 = smov 0  }
   0x3 LB: > { %s1059_s22 = sadd.s32 4294967295, %s1002_s21   ;;  %s857_s23 = sadd.s32 4294967294, %s1002_s21   ;;  %s1002_s21 = sphi %s1044_s21, %s1187_s21   ;;  %s998_s20 = sphi %s1042_s20, %s1186_s20   ;;  %s994_s19 = sphi %s1040_s19, %s1185_s19   ;;  %s990_s18 = sphi %s1038_s18, %s1184_s18  }
   0x4   : > { %s1063_s24 = sadd.s32 1, %s1002_s21   ;;  %s135_s25 = sadd.s32 1, %s998_s20 }
   0x5   : > { %s132_s26 = ssub.s32 %s1002_s21, %s1063_s24  ;;  %p145_p0 = scmp.ne.s32.totalorder %s998_s20, %s994_s19 }
   0x6   : > { %p133_p1 = scmp.eq.s32.totalorder %s132_s26, 0  ;;  %p146_p2 = scmp.eq.s32.totalorder %s1059_s22, 3 }
   0x7   : > { %p151_p3 = scmp.ne.s32.totalorder %s994_s19, %s990_s18  ;;  %p152_p4 = scmp.eq.s32.totalorder %s857_s23, 3 }
   0x8   : > { %s1074_s27 = scalar_select %p133_p1, %s998_s20, %s135_s25  }
   0x9   : > { %p1076_p5 = por %p146_p2, %p145_p0  ;;  %p1080_p6 = por %p152_p4, %p151_p3 }
   0xa   : > { %p860_p7 = scmp.ge.s32.totalorder %s1002_s21, 1  ;;  %p191_p8 = scmp.lt.s32.totalorder %s1002_s21, 5 }
   0xc   : > { %p192_p9 = pnand %p860_p7, %p191_p8 }
   0xd   : > { %s219_s30 = smul.u32 (!%p192_p9), 6, %s1059_s22  ;;  %v250_v0 = vlaneseq (!%p192_p9)  ;;  %v1004_v1 = vmov (!%p192_p9), 1983009808   ;;  %v1005_v3 = vmov (!%p192_p9), 0.0   ;;  %v228_v4 = vld [vmem:[%s1178_s2] sm:$0xff] (!%p192_p9)  ;;  %v1006_v6 = vmov (!%p192_p9), 0  }
   0xe   : > { %195 = sbr.rel (%p192_p9) target bundleno = 499 (0x1f3), region = 40  ;;  %v248_v2 = vunpack.c.l.s4 (!%p192_p9), %v1004_v1  ;;  %355 = vmatprep.mubr.f32.mxu0 (!%p192_p9), %v1005_v3  ;;  %432 = vmatprep.mubr.f32.mxu1 (!%p192_p9), %v1005_v3  ;;  %v229_v8 = vld [vmem:[%s1178_s2 + $0x8] sm:$0xff] (!%p192_p9)  ;;  %vm278_vm0 = vcmask (!%p192_p9), 1041408   ;;  %v226_v16 = vld [vmem:[%s1177_s1] sm:$0xff] (!%p192_p9)  ;;  %vm271_vm1 = vcmask (!%p192_p9), 15360   ;;  %vm551_vm2 = vcmask (!%p192_p9), 130048  }
   0xf   : > { %p220_p10 = scmp.lt.s32.totalorder (!%p192_p9), %s219_s30, 23  ;;  %v251_v5 = vshrl.u32 (!%p192_p9), %v250_v0, 7  ;;  %937 = vset.pattern.permute.xlu0 (!%p192_p9), %v1006_v6  ;;  %938 = vset.pattern.permute.xlu1 (!%p192_p9), %v1006_v6  ;;  %v227_v19 = vld [vmem:[%s1177_s1 + $0x8] sm:$0xff] (!%p192_p9)  ;;  %v231_v20 = vld [vmem:[%s1180_s4] sm:$0x7] (!%p192_p9)  ;;  %s216_s6 = sand.u32 (!%p192_p9), 1, %s994_s19  }
  0x10   : > { %v249_v7 = vunpack.c.0.s8 (!%p192_p9), %v248_v2  ;;  %236 = vperm.xlu0 (!%p192_p9), %937, %v228_v4   ;;  %548 = vperm.xlu1 (!%p192_p9), %938, %v231_v20   ;;  %s894_s7 = smul.u32 (!%p192_p9), 24, %s216_s6  ;;  %s784_s14 = scalar_lea.sflag (!%p192_p9), [#allocation3], %s216_s6 }
  0x11   : > { %s881_s9 = smul.u32 (!%p192_p9), 384, %s1059_s22  ;;  %s1007_s22 = smov (!%p192_p9), [#allocation2]  }
  0x12   : > { %v252_v9 = vsub.s32 (!%p192_p9), %v249_v7, %v251_v5  ;;  %v230_v7 = vld [vmem:[%s1179_s3] sm:$0x7] (!%p192_p9)  ;;  %s218_s8 = scalar_lea.vmem (!%p192_p9), [#allocation2], %s894_s7  ;;  %s944_s16 = sshll.u32 (!%p192_p9), %s1007_s22, 4  ;;  %s945_s16 = int_to_ptr.vmem [resolvable:$false] %s944_s16 }
  0x13   : > { %s946_s17 = scalar_lea.vmem (!%p192_p9), %s945_s16, 768 }
  0x14   : > { %241 = vperm.xlu0 (!%p192_p9), %937, %v229_v8  }
  0x15   : > { %s1189_s30 = smov (!%p220_p10, %s219_s30), 23 }
  0x16   : > { %s861_s10 = sshll.u32 %s1189_s30, 1 }
  0x17   : > { %s223_s13 = scalar_lea.vmem %s1176_s0, %s861_s10  ;;  %s798_s10 = sshll.u32 %s218_s8, 4  ;;  %s1136_s10 = int_to_ptr.vmem [resolvable:$true] %s798_s10 }
  0x18   : > { %v232_v10 = vld [vmem:[%s223_s13] sm:$0xff]  ;;  %v862_v13 = vld.sshfl [vmem:[%s223_s13 + $0x8] sm:$0x33 pattern:$0x76325410]  ;;  %s1134_s13 = scalar_lea.hbm %s1181_s5, %s881_s9  ;;  %s940_s15 = scalar_lea.vmem %s1136_s10, 384 }
  0x19   : > { %v253_v11 = vrot.slane %v232_v10, %v252_v9  ;;  %v246_v12 = vcombine.high %v232_v10, %v232_v10  ;;  %v270_v18 = vcombine.high %v862_v13, %v862_v13  ;;  %p941_p11 = scmp.ne.s32.totalorder %s1136_s10, %s940_s15  ;;  %p947_p0 = scmp.lt.s32.totalorder %s1136_s10, %s945_s16 }
  0x1a   : > { %p948_p1 = scmp.lt.s32.totalorder %s946_s17, %s940_s15 }
  0x1b   : > { %v261_v14 = vcombine.high %v253_v11, %v253_v11  ;;  %v260_v15 = vrot.slane %v246_v12, %v252_v9  ;;  %p942_p12 = pnand %p941_p11, %p1076_p5 }
  0x1c   : > { %p949_p2 = por %p948_p1, %p947_p0 }
  0x1d   : > { %863 = vmatprep.subr.msk.mxu0 %vm278_vm0, %v261_v14  ;;  %v262_v17 = vcombine.high %v260_v15, %v260_v15  ;;  %p943_p13 = pneg %p942_p12 }
  0x1e   : > { %864 = vmatpush1.msk.msra.mxu0 %vm278_vm0, %v253_v11 }
  0x1f   : > { %865 = vmatmul.mubr.msk.f32.vlgmr.msra.gmra.mrb[0].mxu0 %vm271_vm1, %v226_v16  ;;  %867 = vmatprep.subr.msk.mxu1 %vm278_vm0, %v262_v17  ;;  %p950_p3 = pnand %p949_p2, %p943_p13 }
  0x20   : > { %868 = vmatpush1.msk.msra.mxu1 %vm278_vm0, %v260_v15  ;;  %361 = vmatprep.mubr.f32.mxu0 %v1005_v3 }
  0x21   : > { %869 = vmatmul.mubr.msk.f32.vlgmr.msra.gmra.mrb[0].mxu1 %vm271_vm1, %v226_v16  ;;  %871 = vmatprep.subr.msk.mxu0 %vm278_vm0, %v270_v18 }
  0x22   : > { %438 = vmatprep.mubr.f32.mxu1 %v1005_v3  ;;  %872 = vmatpush1.msk.msra.mxu0 %vm278_vm0, %v862_v13 }
  0x23   : > { %866 = vmatmul.mubr.msk.f32.gmra.mrb[2].mxu0 %vm271_vm1, %v227_v19 }
  0x24   : > { %509 = vmatprep.mubr.f32.mxu0 %v1005_v3 }
  0x25   : > { %870 = vmatmul.mubr.msk.f32.gmra.mrb[2].mxu1 %vm271_vm1, %v227_v19 }
  0x26   : > { %619 = vmatprep.mubr.f32.mxu1 %v1005_v3 }
  0x27   : > { %873 = vmatmul.mubr.msk.f32.vlgmr.msra.gmra.mrb[4].mxu0 %vm271_vm1, %v226_v16 }
  0x28   : > { %515 = vmatprep.mubr.f32.mxu0 %v1005_v3 }
  0x2b   : > { %874 = vmatmul.mubr.msk.f32.gmra.mrb[6].mxu0 %vm271_vm1, %v227_v19 }
  0x2c   : > { %761 = vmatprep.mubr.f32.mxu0 %v1005_v3 }
  0x8f   : > { %v237_v21 = vpop.permute.xlu0 %236  ;;  %v549_v15 = vpop.permute.xlu1 %548 }
  0x93   : > { %v242_v27 = vpop.permute.xlu0 %241 }
  0xf2   : > { %v357_v22 = vpop.f32.mrb[0].mxu0 }
  0xf3   : > { %v358_v23 = vadd.f32 %v357_v22, %v237_v21  ;;  %v359_v24 = vpop.f32.mrb[1].mxu0 }
  0xf4   : > { %v360_v25 = vadd.f32 %v359_v24, %v237_v21  ;;  %v434_v26 = vpop.f32.mrb[0].mxu1 }
  0xf5   : > { %v435_v28 = vadd.f32 %v434_v26, %v237_v21  ;;  %v436_v29 = vpop.f32.mrb[1].mxu1  ;;  %v522_v32 = vmul.f32 0.01, %v358_v23 }
  0xf6   : > { %v437_v30 = vadd.f32 %v436_v29, %v237_v21  ;;  %v363_v31 = vpop.f32.mrb[2].mxu0  ;;  %v523_v35 = vmul.f32 0.01, %v360_v25 }
  0xf7   : > { %v364_v33 = vadd.f32 %v363_v31, %v242_v27  ;;  %v365_v34 = vpop.f32.mrb[3].mxu0  ;;  %v524_v38 = vmul.f32 0.01, %v435_v28  ;;  %v534_v46 = vmax.f32 %v358_v23, %v522_v32 }
  0xf8   : > { %v366_v36 = vadd.f32 %v365_v34, %v242_v27  ;;  %v440_v37 = vpop.f32.mrb[2].mxu1  ;;  %v525_v42 = vmul.f32 0.01, %v437_v30  ;;  %v535_v51 = vmax.f32 %v360_v25, %v523_v35 }
  0xf9   : > { %v528_v39 = vmul.f32 0.01, %v364_v33  ;;  %v441_v40 = vadd.f32 %v440_v37, %v242_v27  ;;  %v442_v41 = vpop.f32.mrb[3].mxu1  ;;  %v536_v55 = vmax.f32 %v435_v28, %v524_v38 }
  0xfa   : > { %v529_v43 = vmul.f32 0.01, %v366_v36  ;;  %v443_v44 = vadd.f32 %v442_v41, %v242_v27  ;;  %v511_v45 = vpop.f32.mrb[4].mxu0  ;;  %v537_v58 = vmax.f32 %v437_v30, %v525_v42 }
  0xfb   : > { %v540_v47 = vmax.f32 %v364_v33, %v528_v39  ;;  %v530_v48 = vmul.f32 0.01, %v441_v40  ;;  %v512_v49 = vadd.f32 %v511_v45, %v237_v21  ;;  %v513_v50 = vpop.f32.mrb[5].mxu0 }
  0xfc   : > { %v541_v52 = vmax.f32 %v366_v36, %v529_v43  ;;  %v531_v53 = vmul.f32 0.01, %v443_v44  ;;  %v514_v54 = vadd.f32 %v513_v50, %v237_v21 }
  0xfd   : > { %v884_v56 = vpack.c.bf16 %v540_v47, %v534_v46  ;;  %v542_v57 = vmax.f32 %v441_v40, %v530_v48  ;;  %v526_v63 = vmul.f32 0.01, %v512_v49 }
  0xfe   : > { %v543_v59 = vmax.f32 %v443_v44, %v531_v53  ;;  %v517_v60 = vpop.f32.mrb[6].mxu0  ;;  %v882_v61 = vpack.c.bf16 %v541_v52, %v535_v51  ;;  %v527_v2 = vmul.f32 0.01, %v514_v54 }
  0xff   : > { %v888_v62 = vpack.c.bf16 %v542_v57, %v536_v55  ;;  %v518_v0 = vadd.f32 %v517_v60, %v242_v27  ;;  %v519_v1 = vpop.f32.mrb[7].mxu0  ;;  %v538_v9 = vmax.f32 %v512_v49, %v526_v63 }
 0x100   : > { %v520_v4 = vadd.f32 %v519_v1, %v242_v27  ;;  %883 = vmatprep.subr.bf16.mxu1 %v882_v61  ;;  %v886_v5 = vpack.c.bf16 %v543_v59, %v537_v58  ;;  %v539_v11 = vmax.f32 %v514_v54, %v527_v2 }
 0x101   : > { %v532_v6 = vmul.f32 0.01, %v518_v0  ;;  %885 = vmatpush1.bf16.msra.mxu1 %v884_v56 }
 0x102   : > { %v533_v8 = vmul.f32 0.01, %v520_v4  ;;  %887 = vmatprep.subr.bf16.mxu1 %v886_v5 }
 0x103   : > { %v544_v10 = vmax.f32 %v518_v0, %v532_v6 }
 0x104   : > { %v545_v12 = vmax.f32 %v520_v4, %v533_v8  ;;  %875 = vmatmul.mubr.msk.f32.vlgmr.msra.gmra.mrb[4].mxu1 %vm551_vm2, %v230_v7 }
 0x105   : > { %v892_v13 = vpack.c.bf16 %v544_v10, %v538_v9  ;;  %889 = vmatpush1.bf16.msra.mxu1 %v888_v62  ;;  %690 = vmatprep.mubr.f32.mxu1 %v1005_v3 }
 0x106   : > { %v890_v14 = vpack.c.bf16 %v545_v12, %v539_v11 }
 0x108   : > { %891 = vmatprep.subr.bf16.mxu0 %v890_v14  ;;  %876 = vmatmul.mubr.msk.f32.vlgmr.msra.gmra.mrb[6].mxu1 %vm551_vm2, %v230_v7 }
 0x109   : > { %893 = vmatpush1.bf16.msra.mxu0 %v892_v13 }
 0x10c   : > { %877 = vmatmul.mubr.msk.f32.vlgmr.msra.gmra.mrb[8].mxu0 %vm551_vm2, %v230_v7 }
 0x1d7   : > { %v621_v16 = vpop.f32.mrb[4].mxu1 }
 0x1d8   : > { %v622_v17 = vadd.f32 %v621_v16, %v549_v15  ;;  %v623_v18 = vpop.f32.mrb[5].mxu1 }
 0x1d9   : > { %v624_v19 = vadd.f32 %v623_v18, %v549_v15 }
 0x1db   : > { %v774_v20 = vcombine.low %v622_v17, %v624_v19  ;;  %v692_v21 = vpop.f32.mrb[6].mxu1 }
 0x1dc   : > { %v693_v22 = vadd.f32 %v692_v21, %v549_v15  ;;  %v694_v23 = vpop.f32.mrb[7].mxu1 }
 0x1dd   : > { %780 = vst [vmem:[%s218_s8] sm:$0x77] %v774_v20  ;;  %v695_v3 = vadd.f32 %v694_v23, %v549_v15 }
 0x1df   : > { %v763_v24 = vpop.f32.mrb[8].mxu0  ;;  %v775_v25 = vcombine.low %v693_v22, %v695_v3 }
 0x1e0   : > { %v764_v26 = vadd.f32 %v763_v24, %v549_v15  ;;  %v765_v27 = vpop.f32.mrb[9].mxu0 }
 0x1e1   : > { %781 = vst [vmem:[%s218_s8 + $0x8] sm:$0x77] %v775_v25  ;;  %v766_v28 = vadd.f32 %v765_v27, %v549_v15 }
 0x1e3   : > { %v776_v29 = vcombine.low %v764_v26, %v766_v28 }
 0x1e5   : > { %782 = vst [vmem:[%s218_s8 + $0x10] sm:$0x77] %v776_v29 }
 0x1e6   : > { %953 = shalt.err (!%p950_p3)
}
 0x1e7   : > { %s954_s23 = scalar_lea.hbm %s1134_s13, 384  ;;  %s958_s30 = scalar_lea.hbm %s1181_s5, 1536 }
 0x1e8   : > { %p955_p4 = scmp.ne.s32.totalorder %s1134_s13, %s954_s23  ;;  %p959_p9 = scmp.lt.u32.totalorder %s1134_s13, %s1181_s5 }
 0x1e9   : > { %p960_p10 = scmp.lt.u32.totalorder %s958_s30, %s954_s23  ;;  %p962_p12 = scmp.lt.u32.totalorder %s954_s23, %s1134_s13 }
 0x1ea   : > { %p956_p7 = pnand %p955_p4, %p1076_p5 }
 0x1eb   : > { %p961_p11 = por %p960_p10, %p959_p9 }
 0x1ec   : > { %p957_p8 = pneg %p956_p7 }
 0x1ed   : > { %p963_p13 = por %p962_p12, %p961_p11 }
 0x1ef   : > { %p964_p0 = pnand %p963_p13, %p957_p8 }
 0x1f1   : > { %967 = shalt.err (!%p964_p0)
}
 0x1f2   : > { %895 = dma.vmem_to_hbm [thread:$0]  (%p1076_p5), %s1136_s10, 384, %s1134_s13, %s784_s14  }
 0x1f3 PF: > { %p901_p1 = scmp.ge.s32.totalorder %s1002_s21, 2  ;;  %s810_s8 = sand.u32 1, %s990_s18  }
 0x1f4   : > { %s811_s9 = scalar_lea.sflag [#allocation3], %s810_s8 }
 0x1f5   : > { %p898_p2 = pnand %p901_p1, %p1080_p6 }
 0x1f7   : > { %985 = dma.done.wait (!%p898_p2), %s811_s9, 384  }
 0x1f8   : > { %987 = vsyncadd (!%p898_p2), %s811_s9, 4294966912  ;;  %p15_p3 = scmp.ge.s32.totalorder %s1063_s24, 6   ;;  %s1184_s18 = smov %s994_s19 }
 0x1f9   : > { %s1185_s19 = smov %s998_s20  ;;  %s1186_s20 = smov %s1074_s27 }
 0x1fa   : > { %s1187_s21 = smov %s1063_s24  ;;  %17 = sbr.rel (!%p15_p3) target bundleno = 3 (0x3), region = 75 }
 0x201   :  { %816 = vsyncpa [#allocation3], 1 }
 0x202   :  { %818 = vsyncpa [#allocation3 + $0x1], 1 }

</bundles_post_ra>
